<compile_context>
chip_gen: v7x
topology: tpu7x:2x2x1
jax: 0.10.0
libtpu: 0.0.40
codegen_flags: <defaults>
</compile_context>

<pallas_src>
import functools

import jax
import jax.numpy as jnp
from jax.experimental import pallas as pl
from jax.experimental.pallas import tpu as pltpu

LANE = 128
SUBLANE = 8


def _round_up(x, m):
    return ((x + m - 1) // m) * m


def _physical_vmem_bytes():
    # Per-core VMEM capacity; fall back to the smallest current chip (v7x: 64 MiB).
    try:
        return int(pltpu.get_tpu_info().vmem_capacity_bytes)
    except Exception:
        return 64 << 20


def _vmem_budget():
    # ~25% headroom for compiler-internal scratch: ~48 MiB on v7x, ~96 MiB on
    # 128-MiB chips (v5e/v6e), instead of requesting the full physical VMEM.
    return int(0.75 * _physical_vmem_bytes())


def _vmem_limit(working_set, budget):
    return int(min(budget, max(2 * working_set, 8 << 20)))


# ----------------------------- Pallas kernels ---------------------------------
def gcn_prop_kernel(a_ref, x_ref, w_ref, b_ref, o_ref, acc_ref, *,
                    apply_relu, feat_resident, tk):
    """One GCN layer row tile: o[i] = f( (sum_k A[i,k] @ X[k]) @ W + b )."""
    k = pl.program_id(1)

    @pl.when(k == 0)
    def _():
        acc_ref[...] = jnp.zeros_like(acc_ref)

    if feat_resident:
        start = pl.multiple_of(k * tk, tk)
        feat = x_ref[pl.ds(start, tk), :]
    else:
        feat = x_ref[...]
    # Propagation matmul on the MXU, f32 accumulation in VMEM scratch.
    acc_ref[...] += jnp.dot(a_ref[...], feat, preferred_element_type=jnp.float32)

    @pl.when(k == pl.num_programs(1) - 1)
    def _():
        # Feature transform + bias (+ ReLU); LHS stays f32 (precision feedback).
        h = jnp.dot(acc_ref[...], w_ref[...].astype(jnp.float32),
                    preferred_element_type=jnp.float32) + b_ref[...]
        if apply_relu:
            h = jnp.maximum(h, 0.0)
        o_ref[...] = h.astype(o_ref.dtype)


def gcn_layer2_pool_linear_kernel(a_ref, h_ref, w_ref, b_ref, p_ref, wl_ref,
                                  bl_ref, o_ref, acc_ref, pool_ref, *,
                                  feat_resident, tk):
    """Fused: h2 row tile -> pooled accumulation -> final Linear+ReLU epilogue."""
    i = pl.program_id(0)
    k = pl.program_id(1)
    last_k = pl.num_programs(1) - 1

    @pl.when(jnp.logical_and(i == 0, k == 0))
    def _():
        pool_ref[...] = jnp.zeros_like(pool_ref)

    @pl.when(k == 0)
    def _():
        acc_ref[...] = jnp.zeros_like(acc_ref)

    if feat_resident:
        start = pl.multiple_of(k * tk, tk)
        feat = h_ref[pl.ds(start, tk), :]
    else:
        feat = h_ref[...]
    acc_ref[...] += jnp.dot(a_ref[...], feat, preferred_element_type=jnp.float32)

    @pl.when(k == last_k)
    def _():
        # h2 row tile in f32, never written to HBM.
        h2 = jnp.dot(acc_ref[...], w_ref[...].astype(jnp.float32),
                     preferred_element_type=jnp.float32) + b_ref[...]
        # Accumulate pooled sums: (g_pad, tm) @ (tm, d_pad), exact f32 pooling.
        pool_ref[...] += jnp.dot(p_ref[...], h2, preferred_element_type=jnp.float32)

    @pl.when(jnp.logical_and(i == pl.num_programs(0) - 1, k == last_k))
    def _():
        out = jnp.dot(pool_ref[...], wl_ref[...].astype(jnp.float32),
                      preferred_element_type=jnp.float32) + bl_ref[...]
        o_ref[...] = jnp.maximum(out, 0.0)


def gcn_small_fused_kernel(a_ref, x_ref, w1_ref, b1_ref, w2_ref, b2_ref,
                           p_ref, wl_ref, bl_ref, o_ref):
    """Whole network in one VMEM-resident kernel (small-problem path, all f32)."""
    a = a_ref[...]
    h = jnp.dot(a, x_ref[...], preferred_element_type=jnp.float32)
    h = jnp.dot(h, w1_ref[...], preferred_element_type=jnp.float32) + b1_ref[...]
    h = jnp.maximum(h, 0.0)
    h = jnp.dot(a, h, preferred_element_type=jnp.float32)
    h = jnp.dot(h, w2_ref[...], preferred_element_type=jnp.float32) + b2_ref[...]
    pooled = jnp.dot(p_ref[...], h, preferred_element_type=jnp.float32)
    out = jnp.dot(pooled, wl_ref[...], preferred_element_type=jnp.float32) + bl_ref[...]
    o_ref[...] = jnp.maximum(out, 0.0)


# --------------------------- planning & wrappers -------------------------------
def _plan_tiles(n_pad, d_pad, o_pad, g_pad, budget):
    """Pick (tm, tk, feat_resident, working_set_bytes) for the tiled kernels."""

    def ws(resident, tm, tk):
        feat = (n_pad if resident else tk) * d_pad * 2 * 2     # bf16, 2 pipeline bufs
        return (2 * tm * tk * 2            # A_hat tile (bf16, double-buffered)
                + feat                     # features (X or h1)
                + 2 * d_pad * d_pad * 2    # W (constant index map -> fetched once)
                + 2 * d_pad * 4            # bias (f32)
                + 2 * tm * d_pad * 2       # layer-1 output tile
                + tm * d_pad * 4           # f32 accumulator
                + 2 * g_pad * tm * 4       # pooling tile (fused layer 2, f32)
                + 2 * d_pad * o_pad * 2    # W_lin
                + 2 * o_pad * 4            # b_lin
                + g_pad * d_pad * 4        # pooled accumulator
                + 2 * g_pad * o_pad * 4)   # final output

    tm, tk = 256, 512                      # big contraction tile for the A_hat stream
    if ws(True, tm, tk) <= budget:
        return tm, tk, True, ws(True, tm, tk)
    while ws(False, tm, tk) > budget and tk > LANE:
        tk //= 2
    while ws(False, tm, tk) > budget and tm > LANE:
        tm //= 2
    # TODO(synk): if resident W (2*d_pad^2*2B) alone overflows the budget, the
    # feature dimension needs its own grid axis rather than tile shrinking.
    return tm, tk, False, ws(False, tm, tk)


def _gcn_layer1(a_p, x_p, w_p, b_p, *, tm, tk, feat_resident, vmem_limit):
    n_pad = a_p.shape[0]
    d_pad = w_p.shape[1]
    grid = (n_pad // tm, n_pad // tk)
    if feat_resident:
        feat_spec = pl.BlockSpec((n_pad, d_pad), lambda i, k: (0, 0))
    else:
        feat_spec = pl.BlockSpec((tk, d_pad), lambda i, k: (k, 0))
    kernel = functools.partial(gcn_prop_kernel, apply_relu=True,
                               feat_resident=feat_resident, tk=tk)
    return pl.pallas_call(
        kernel,
        out_shape=jax.ShapeDtypeStruct((n_pad, d_pad), jnp.bfloat16),
        grid_spec=pltpu.PrefetchScalarGridSpec(
            num_scalar_prefetch=0,
            grid=grid,
            in_specs=[
                pl.BlockSpec((tm, tk), lambda i, k: (i, k)),        # A_hat tile
                feat_spec,                                          # X
                pl.BlockSpec((d_pad, d_pad), lambda i, k: (0, 0)),  # W1 (resident)
                pl.BlockSpec((1, d_pad), lambda i, k: (0, 0)),      # b1 (resident)
            ],
            out_specs=pl.BlockSpec((tm, d_pad), lambda i, k: (i, 0)),
            scratch_shapes=[pltpu.VMEM((tm, d_pad), jnp.float32)],
        ),
        compiler_params=pltpu.CompilerParams(
            # On this path n_pad >= 1024, so >= 4 row blocks: both v7x TCs stay busy.
            dimension_semantics=("parallel", "arbitrary"),
            vmem_limit_bytes=vmem_limit,
        ),
    )(a_p, x_p, w_p, b_p)


def _gcn_layer2_pool_linear(a_p, h1, w_p, b_p, p_p, wl_p, bl_p, *,
                            tm, tk, feat_resident, vmem_limit):
    n_pad = a_p.shape[0]
    d_pad = w_p.shape[1]
    g_pad = p_p.shape[0]
    o_pad = wl_p.shape[1]
    grid = (n_pad // tm, n_pad // tk)
    if feat_resident:
        feat_spec = pl.BlockSpec((n_pad, d_pad), lambda i, k: (0, 0))
    else:
        feat_spec = pl.BlockSpec((tk, d_pad), lambda i, k: (k, 0))
    kernel = functools.partial(gcn_layer2_pool_linear_kernel,
                               feat_resident=feat_resident, tk=tk)
    return pl.pallas_call(
        kernel,
        out_shape=jax.ShapeDtypeStruct((g_pad, o_pad), jnp.float32),
        grid_spec=pltpu.PrefetchScalarGridSpec(
            num_scalar_prefetch=0,
            grid=grid,
            in_specs=[
                pl.BlockSpec((tm, tk), lambda i, k: (i, k)),        # A_hat tile
                feat_spec,                                          # h1
                pl.BlockSpec((d_pad, d_pad), lambda i, k: (0, 0)),  # W2 (resident)
                pl.BlockSpec((1, d_pad), lambda i, k: (0, 0)),      # b2 (resident)
                pl.BlockSpec((g_pad, tm), lambda i, k: (0, i)),     # pooling columns (f32)
                pl.BlockSpec((d_pad, o_pad), lambda i, k: (0, 0)),  # W_lin (resident)
                pl.BlockSpec((1, o_pad), lambda i, k: (0, 0)),      # b_lin (resident)
            ],
            out_specs=pl.BlockSpec((g_pad, o_pad), lambda i, k: (0, 0)),
            scratch_shapes=[pltpu.VMEM((tm, d_pad), jnp.float32),   # propagate acc
                            pltpu.VMEM((g_pad, d_pad), jnp.float32)],  # pooled acc
        ),
        compiler_params=pltpu.CompilerParams(
            # Row axis must stay sequential: the pooled accumulator is carried
            # across row tiles (megacore parallelism is kept on the layer-1 call).
            dimension_semantics=("arbitrary", "arbitrary"),
            vmem_limit_bytes=vmem_limit,
        ),
    )(a_p, h1, w_p, b_p, p_p, wl_p, bl_p)


def _gcn_small_fused(a_p, x_p, w1_p, b1_p, w2_p, b2_p, p_p, wl_p, bl_p, *, vmem_limit):
    g_pad = p_p.shape[0]
    o_pad = wl_p.shape[1]
    return pl.pallas_call(
        gcn_small_fused_kernel,
        out_shape=jax.ShapeDtypeStruct((g_pad, o_pad), jnp.float32),
        compiler_params=pltpu.CompilerParams(vmem_limit_bytes=vmem_limit),
    )(a_p, x_p, w1_p, b1_p, w2_p, b2_p, p_p, wl_p, bl_p)


# ------------------------------ JAX glue --------------------------------------
def build_normalized_adjacency(edge_index, num_nodes, n_pad=None):
    """Dense A_hat = D^-1/2 (A+I) D^-1/2, built directly at padded size."""
    n_pad = num_nodes if n_pad is None else n_pad
    src, dst = edge_index[0], edge_index[1]
    a = jnp.zeros((n_pad, n_pad), jnp.float32)
    a = a.at[dst, src].add(1.0)                                # message j -> i
    # add_remaining_self_loops: only where the diagonal is still 0, and only for
    # real nodes so padded rows/cols stay exactly zero.
    idx = jnp.arange(n_pad)
    need_loop = (jnp.diagonal(a) == 0.0) & (idx < num_nodes)
    a = a.at[idx, idx].add(need_loop.astype(jnp.float32))
    deg = jnp.sum(a, axis=1)
    d_inv_sqrt = jnp.where(deg > 0, jax.lax.rsqrt(deg), 0.0)
    return a * d_inv_sqrt[:, None] * d_inv_sqrt[None, :]


def build_pooling_matrix(batch, num_graphs, pooling, g_pad=None, n_pad=None):
    """(G_pad, N_pad) f32 matrix so pooled = P @ X matches global_{mean,add}_pool."""
    n = batch.shape[0]
    g_pad = num_graphs if g_pad is None else g_pad
    n_pad = n if n_pad is None else n_pad
    batch_p = jnp.pad(batch, (0, n_pad - n), constant_values=-1)  # padded nodes -> none
    onehot = (batch_p[None, :] == jnp.arange(g_pad)[:, None]).astype(jnp.float32)
    if pooling == "mean":
        counts = jnp.maximum(jnp.sum(onehot, axis=1, keepdims=True), 1.0)
        return onehot / counts
    elif pooling == "add":
        return onehot
    # TODO(synk): 'max' pooling is a segment-max, not a matmul; not implemented here.
    raise NotImplementedError("only 'mean' and 'add' pooling are implemented")


@functools.partial(jax.jit, static_argnames=("num_graphs", "pooling"))
def gcnnet_forward(x, edge_index, batch, params, *, num_graphs, pooling="mean"):
    n, dim_in = x.shape
    w1, b1, w2, b2, wl, bl = params
    dim_out = wl.shape[1]

    d_pad = _round_up(max(dim_in, LANE), LANE)
    o_pad = _round_up(max(dim_out, LANE), LANE)
    g_pad = _round_up(max(num_graphs, SUBLANE), SUBLANE)
    budget = _vmem_budget()

    # Small-problem path: one fused VMEM-resident kernel (three tiled pallas_calls
    # would be pure launch/DMA overhead at these sizes).
    n_small = _round_up(max(n, LANE), LANE)
    small = (n_small <= 512) and (d_pad <= 512) and (o_pad <= 512)
    n_pad = n_small if small else _round_up(max(n, 512), 512)   # divisible by all tiles

    # TODO(synk): dense A_hat is O(N^2) HBM traffic; large sparse graphs need a
    # scalar-prefetch gather / segment-sum propagation kernel instead.
    a_hat = build_normalized_adjacency(edge_index, n, n_pad)          # (n_pad, n_pad) f32
    pool_mat = build_pooling_matrix(batch, num_graphs, pooling, g_pad, n_pad)  # f32

    def pad2(m, r, c):
        return jnp.pad(m, ((0, r - m.shape[0]), (0, c - m.shape[1])))

    x_p = pad2(x, n_pad, d_pad)
    w1_p = pad2(w1, d_pad, d_pad)
    w2_p = pad2(w2, d_pad, d_pad)
    wl_p = pad2(wl, d_pad, o_pad)
    b1_p = pad2(b1.reshape(1, -1), 1, d_pad)
    b2_p = pad2(b2.reshape(1, -1), 1, d_pad)
    bl_p = pad2(bl.reshape(1, -1), 1, o_pad)

    if small:
        ws = 4 * (n_pad * n_pad + 3 * n_pad * d_pad + 2 * d_pad * d_pad
                  + d_pad * o_pad + g_pad * n_pad + 2 * g_pad * d_pad)
        out = _gcn_small_fused(a_hat, x_p, w1_p, b1_p, w2_p, b2_p,
                               pool_mat, wl_p, bl_p,
                               vmem_limit=_vmem_limit(ws, budget))
    else:
        tm, tk, feat_res, ws = _plan_tiles(n_pad, d_pad, o_pad, g_pad, budget)
        vlim = _vmem_limit(ws, budget)
        # Streamed operands in bf16 (f32 accumulation stays in-kernel); pooling
        # matrix and biases stay f32 for exact mean pooling / bias add.
        a_bf = a_hat.astype(jnp.bfloat16)
        h1 = _gcn_layer1(a_bf, x_p.astype(jnp.bfloat16),
                         w1_p.astype(jnp.bfloat16), b1_p,
                         tm=tm, tk=tk, feat_resident=feat_res, vmem_limit=vlim)
        out = _gcn_layer2_pool_linear(a_bf, h1, w2_p.astype(jnp.bfloat16), b2_p,
                                      pool_mat, wl_p.astype(jnp.bfloat16), bl_p,
                                      tm=tm, tk=tk, feat_resident=feat_res,
                                      vmem_limit=vlim)
    return out[:num_graphs, :dim_out]


def gcnnet_reference(x, edge_index, batch, params, *, num_graphs, pooling="mean"):
    """Pure-JAX f32 reference for correctness checking."""
    a_hat = build_normalized_adjacency(edge_index, x.shape[0])
    pool_mat = build_pooling_matrix(batch, num_graphs, pooling)
    w1, b1, w2, b2, wl, bl = params
    h = jnp.maximum(a_hat @ x @ w1 + b1, 0.0)
    h = a_hat @ h @ w2 + b2
    return jnp.maximum(pool_mat @ h @ wl + bl, 0.0)


def init_params(key, dim_in, dim_out):
    """Deterministic glorot-ish init matching the module's parameter shapes."""
    k1, k2, k3 = jax.random.split(key, 3)
    s_in = 1.0 / jnp.sqrt(jnp.float32(dim_in))
    w1 = jax.random.uniform(k1, (dim_in, dim_in), jnp.float32, -s_in, s_in)
    b1 = jnp.zeros((1, dim_in), jnp.float32)
    w2 = jax.random.uniform(k2, (dim_in, dim_in), jnp.float32, -s_in, s_in)
    b2 = jnp.zeros((1, dim_in), jnp.float32)
    wl = jax.random.uniform(k3, (dim_in, dim_out), jnp.float32, -s_in, s_in)
    bl = jnp.zeros((1, dim_out), jnp.float32)
    return (w1, b1, w2, b2, wl, bl)


if __name__ == "__main__":
    def make_case(key, num_nodes, dim_in, dim_out, num_graphs, num_edges):
        kx, ke, kp = jax.random.split(key, 3)
        x = jax.random.normal(kx, (num_nodes, dim_in), jnp.float32)
        e = jax.random.randint(ke, (2, num_edges), 0, num_nodes, jnp.int32)
        edge_index = jnp.concatenate([e, e[::-1]], axis=1)          # symmetrized
        batch = jnp.repeat(jnp.arange(num_graphs, dtype=jnp.int32),
                           num_nodes // num_graphs)
        params = init_params(kp, dim_in, dim_out)
        return x, edge_index, batch, params

    # --- Small demo shapes: exercises the single fused VMEM-resident kernel. ---
    x, ei, batch, params = make_case(jax.random.PRNGKey(0), num_nodes=16,
                                     dim_in=32, dim_out=8, num_graphs=2,
                                     num_edges=24)
    out = gcnnet_forward(x, ei, batch, params, num_graphs=2, pooling="mean")
    jax.block_until_ready(out)
    assert out.shape == (2, 8)
    ref = gcnnet_reference(x, ei, batch, params, num_graphs=2, pooling="mean")
    err = float(jnp.max(jnp.abs(out - ref)))
    assert err < 3e-2, f"small-path mismatch: max_err={err}"

    # --- Larger shapes: exercises the tiled propagate + fused pool/linear path. ---
    x2, ei2, batch2, params2 = make_case(jax.random.PRNGKey(1), num_nodes=600,
                                         dim_in=32, dim_out=8, num_graphs=3,
                                         num_edges=2400)
    out2 = gcnnet_forward(x2, ei2, batch2, params2, num_graphs=3, pooling="mean")
    jax.block_until_ready(out2)
    assert out2.shape == (3, 8)
    ref2 = gcnnet_reference(x2, ei2, batch2, params2, num_graphs=3, pooling="mean")
    err2 = float(jnp.max(jnp.abs(out2 - ref2)))
    scale2 = float(jnp.max(jnp.abs(ref2)))
    assert err2 < max(5e-2, 3e-2 * scale2), \
        f"tiled-path mismatch: max_err={err2} (ref scale {scale2})"

    print("KERNEL_OK")
</pallas_src>

<mosaic_0001>
module attributes {stable_mosaic.version = 11 : i64} {
  func.func private @main(%arg0: i32) attributes {dimension_semantics = [#tpu.dimension_semantics<core_parallel>], iteration_bounds = array<i64: 2>, tpu.core_type = #tpu.core_type<sc_scalar_subcore>, window_params = []} {
    return
  }
}

module attributes {stable_mosaic.version = 11 : i64} {
  func.func private @main(%arg0: i32) attributes {dimension_semantics = [#tpu.dimension_semantics<core_parallel>], iteration_bounds = array<i64: 2>, tpu.core_type = #tpu.core_type<sc_scalar_subcore>, window_params = []} {
    return
  }
}

module attributes {stable_mosaic.version = 11 : i64} {
  func.func @gcn_small_fused_kernel(%arg0: memref<128x128xf32, #tpu.memory_space<vmem>>, %arg1: memref<128x128xf32, #tpu.memory_space<vmem>>, %arg2: memref<128x128xf32, #tpu.memory_space<vmem>>, %arg3: memref<1x128xf32, #tpu.memory_space<vmem>>, %arg4: memref<128x128xf32, #tpu.memory_space<vmem>>, %arg5: memref<1x128xf32, #tpu.memory_space<vmem>>, %arg6: memref<8x128xf32, #tpu.memory_space<vmem>>, %arg7: memref<128x128xf32, #tpu.memory_space<vmem>>, %arg8: memref<1x128xf32, #tpu.memory_space<vmem>>, %arg9: memref<8x128xf32, #tpu.memory_space<vmem>>) attributes {dimension_semantics = [], scalar_prefetch = 0 : i64, scratch_operands = 0 : i64, tpu.core_type = #tpu.core_type<tc>} {
    %c0 = arith.constant 0 : index
    %c0_0 = arith.constant 0 : index
    %0 = vector.load %arg0[%c0, %c0_0] : memref<128x128xf32, #tpu.memory_space<vmem>>, vector<128x128xf32>
    %c0_1 = arith.constant 0 : index
    %c0_2 = arith.constant 0 : index
    %1 = vector.load %arg1[%c0_1, %c0_2] : memref<128x128xf32, #tpu.memory_space<vmem>>, vector<128x128xf32>
    %cst = arith.constant dense<0.000000e+00> : vector<128x128xf32>
    %2 = tpu.matmul %0, %1, %cst {dimension_numbers = #tpu.dot_dimension_numbers<[1], [0], [0], [1], [0, 0, 1, 1], [], []>} : vector<128x128xf32>, vector<128x128xf32>, vector<128x128xf32> -> vector<128x128xf32>
    %c0_3 = arith.constant 0 : index
    %c0_4 = arith.constant 0 : index
    %3 = vector.load %arg2[%c0_3, %c0_4] : memref<128x128xf32, #tpu.memory_space<vmem>>, vector<128x128xf32>
    %cst_5 = arith.constant dense<0.000000e+00> : vector<128x128xf32>
    %4 = tpu.matmul %2, %3, %cst_5 {dimension_numbers = #tpu.dot_dimension_numbers<[1], [0], [0], [1], [0, 0, 1, 1], [], []>} : vector<128x128xf32>, vector<128x128xf32>, vector<128x128xf32> -> vector<128x128xf32>
    %c0_6 = arith.constant 0 : index
    %c0_7 = arith.constant 0 : index
    %5 = vector.load %arg3[%c0_6, %c0_7] : memref<1x128xf32, #tpu.memory_space<vmem>>, vector<1x128xf32>
    %6 = vector.broadcast %5 : vector<1x128xf32> to vector<128x128xf32>
    %7 = arith.addf %4, %6 : vector<128x128xf32>
    %cst_8 = arith.constant 0.000000e+00 : f32
    %8 = vector.broadcast %cst_8 : f32 to vector<128x128xf32>
    %9 = arith.maximumf %7, %8 : vector<128x128xf32>
    %cst_9 = arith.constant dense<0.000000e+00> : vector<128x128xf32>
    %10 = tpu.matmul %0, %9, %cst_9 {dimension_numbers = #tpu.dot_dimension_numbers<[1], [0], [0], [1], [0, 0, 1, 1], [], []>} : vector<128x128xf32>, vector<128x128xf32>, vector<128x128xf32> -> vector<128x128xf32>
    %c0_10 = arith.constant 0 : index
    %c0_11 = arith.constant 0 : index
    %11 = vector.load %arg4[%c0_10, %c0_11] : memref<128x128xf32, #tpu.memory_space<vmem>>, vector<128x128xf32>
    %cst_12 = arith.constant dense<0.000000e+00> : vector<128x128xf32>
    %12 = tpu.matmul %10, %11, %cst_12 {dimension_numbers = #tpu.dot_dimension_numbers<[1], [0], [0], [1], [0, 0, 1, 1], [], []>} : vector<128x128xf32>, vector<128x128xf32>, vector<128x128xf32> -> vector<128x128xf32>
    %c0_13 = arith.constant 0 : index
    %c0_14 = arith.constant 0 : index
    %13 = vector.load %arg5[%c0_13, %c0_14] : memref<1x128xf32, #tpu.memory_space<vmem>>, vector<1x128xf32>
    %14 = vector.broadcast %13 : vector<1x128xf32> to vector<128x128xf32>
    %15 = arith.addf %12, %14 : vector<128x128xf32>
    %c0_15 = arith.constant 0 : index
    %c0_16 = arith.constant 0 : index
    %16 = vector.load %arg6[%c0_15, %c0_16] : memref<8x128xf32, #tpu.memory_space<vmem>>, vector<8x128xf32>
    %cst_17 = arith.constant dense<0.000000e+00> : vector<8x128xf32>
    %17 = tpu.matmul %16, %15, %cst_17 {dimension_numbers = #tpu.dot_dimension_numbers<[1], [0], [0], [1], [0, 0, 1, 1], [], []>} : vector<8x128xf32>, vector<128x128xf32>, vector<8x128xf32> -> vector<8x128xf32>
    %c0_18 = arith.constant 0 : index
    %c0_19 = arith.constant 0 : index
    %18 = vector.load %arg7[%c0_18, %c0_19] : memref<128x128xf32, #tpu.memory_space<vmem>>, vector<128x128xf32>
    %cst_20 = arith.constant dense<0.000000e+00> : vector<8x128xf32>
    %19 = tpu.matmul %17, %18, %cst_20 {dimension_numbers = #tpu.dot_dimension_numbers<[1], [0], [0], [1], [0, 0, 1, 1], [], []>} : vector<8x128xf32>, vector<128x128xf32>, vector<8x128xf32> -> vector<8x128xf32>
    %c0_21 = arith.constant 0 : index
    %c0_22 = arith.constant 0 : index
    %20 = vector.load %arg8[%c0_21, %c0_22] : memref<1x128xf32, #tpu.memory_space<vmem>>, vector<1x128xf32>
    %21 = vector.broadcast %20 : vector<1x128xf32> to vector<8x128xf32>
    %22 = arith.addf %19, %21 : vector<8x128xf32>
    %cst_23 = arith.constant 0.000000e+00 : f32
    %23 = vector.broadcast %cst_23 : f32 to vector<8x128xf32>
    %24 = arith.maximumf %22, %23 : vector<8x128xf32>
    %c0_24 = arith.constant 0 : index
    %c0_25 = arith.constant 0 : index
    %25 = vector.load %arg9[%c0_24, %c0_25] : memref<8x128xf32, #tpu.memory_space<vmem>>, vector<8x128xf32>
    tpu.vector_store %arg9[%c0_24, %c0_25], %24 {strides = array<i32>} : memref<8x128xf32, #tpu.memory_space<vmem>>, vector<8x128xf32>,
    return
  }
}

</mosaic_0001>

<bundles_post_ra>
// kernel: gcnnet_forward.1
= control target key start
LH: loop header
LB: loop body
LE: loop exit
PB: predicated region body
PF: predicated region fallthrough
CT: control target
= control target key end

     0   :  { %vm1515_vm0 = vmmov 0   ;;  %s1920_s1 = inlined_call_operand.vmem [shape: f32[128,128], index: 1, kind: input, shape index: {}]   ;;  %s1921_s0 = inlined_call_operand.vmem [shape: f32[128,128], index: 0, kind: input, shape index: {}]   ;;  %s1922_s2 = inlined_call_operand.vmem [shape: f32[128,128], index: 2, kind: input, shape index: {}]   ;;  %s1923_s4 = inlined_call_operand.vmem [shape: f32[128,128], index: 4, kind: input, shape index: {}]   ;;  %s1924_s3 = inlined_call_operand.vmem [shape: f32[1,128], index: 3, kind: input, shape index: {}]   ;;  %s1925_s7 = inlined_call_operand.vmem [shape: f32[128,128], index: 7, kind: input, shape index: {}]   ;;  %s1926_s5 = inlined_call_operand.vmem [shape: f32[1,128], index: 5, kind: input, shape index: {}]   ;;  %s1927_s6 = inlined_call_operand.vmem [shape: f32[8,128], index: 6, kind: input, shape index: {}]   ;;  %s1928_s8 = inlined_call_operand.vmem [shape: f32[1,128], index: 8, kind: input, shape index: {}]   ;;  %s1929_s9 = inlined_call_operand.vmem [shape: f32[8,128], index: 9, kind: output, shape index: {}]  }
   0x1   :  { %v48_v0 = vld [vmem:[%s1920_s1] sm:$0xff]  ;;  %v49_v1 = vld [vmem:[%s1920_s1 + $0x8] sm:$0xff]  ;;  %v50_v2 = vld [vmem:[%s1920_s1 + $0x10] sm:$0xff] }
   0x2   :  { %v1335_v3 = vpack.c.bf16 %v49_v1, %v48_v0  ;;  %v51_v4 = vld [vmem:[%s1920_s1 + $0x18] sm:$0xff]  ;;  %v52_v6 = vld [vmem:[%s1920_s1 + $0x20] sm:$0xff]  ;;  %v53_v7 = vld [vmem:[%s1920_s1 + $0x28] sm:$0xff] }
   0x3   :  { %v1339_v5 = vpack.c.bf16 %v51_v4, %v50_v2  ;;  %v1343_v8 = vpack.c.bf16 %v53_v7, %v52_v6  ;;  %v1588_v9 = vld [vmem:[%s1921_s0] sm:$0xff]  ;;  %v54_v10 = vld [vmem:[%s1920_s1 + $0x30] sm:$0xff]  ;;  %v55_v11 = vld [vmem:[%s1920_s1 + $0x38] sm:$0xff] }
   0x4   :  { %1336 = vmatprep.subr.bf16.mxu0 %v1335_v3  ;;  %1073 = vmatprep.mubr.f32.mxu0 %v1588_v9  ;;  %v1347_v12 = vpack.c.bf16 %v55_v11, %v54_v10  ;;  %v56_v13 = vld [vmem:[%s1920_s1 + $0x40] sm:$0xff]  ;;  %v57_v14 = vld [vmem:[%s1920_s1 + $0x48] sm:$0xff]  ;;  %v211_v17 = vld [vmem:[%s1922_s2 + $0x10] sm:$0xff] }
   0x5   :  { %1338 = vmatpush3.bf16.msra.mxu0 %v1335_v3  ;;  %v209_v15 = vld [vmem:[%s1922_s2] sm:$0xff]  ;;  %v210_v16 = vld [vmem:[%s1922_s2 + $0x8] sm:$0xff]  ;;  %v212_v18 = vld [vmem:[%s1922_s2 + $0x18] sm:$0xff]  ;;  %v1351_v21 = vpack.c.bf16 %v57_v14, %v56_v13 }
   0x6   :  { %1340 = vmatprep.subr.bf16.mxu0 %v1339_v5  ;;  %v1367_v19 = vpack.c.bf16 %v210_v16, %v209_v15  ;;  %v1371_v20 = vpack.c.bf16 %v212_v18, %v211_v17  ;;  %v213_v22 = vld [vmem:[%s1922_s2 + $0x20] sm:$0xff]  ;;  %v214_v23 = vld [vmem:[%s1922_s2 + $0x28] sm:$0xff]  ;;  %v58_v24 = vld [vmem:[%s1920_s1 + $0x50] sm:$0xff] }
   0x7   :  { %v59_v25 = vld [vmem:[%s1920_s1 + $0x58] sm:$0xff]  ;;  %v1375_v26 = vpack.c.bf16 %v214_v23, %v213_v22  ;;  %v215_v28 = vld [vmem:[%s1922_s2 + $0x30] sm:$0xff]  ;;  %v60_v30 = vld [vmem:[%s1920_s1 + $0x60] sm:$0xff] }
   0x8   :  { %1368 = vmatprep.subr.bf16.mxu1 %v1367_v19  ;;  %v1355_v27 = vpack.c.bf16 %v59_v25, %v58_v24  ;;  %v216_v29 = vld [vmem:[%s1922_s2 + $0x38] sm:$0xff]  ;;  %v61_v31 = vld [vmem:[%s1920_s1 + $0x68] sm:$0xff]  ;;  %v217_v34 = vld [vmem:[%s1922_s2 + $0x40] sm:$0xff] }
   0x9   :  { %1342 = vmatpush3.bf16.msra.mxu0 %v1339_v5  ;;  %1370 = vmatpush3.bf16.msra.mxu1 %v1367_v19  ;;  %v1379_v32 = vpack.c.bf16 %v216_v29, %v215_v28  ;;  %v1359_v33 = vpack.c.bf16 %v61_v31, %v60_v30  ;;  %v218_v35 = vld [vmem:[%s1922_s2 + $0x48] sm:$0xff]  ;;  %v62_v36 = vld [vmem:[%s1920_s1 + $0x70] sm:$0xff]  ;;  %v63_v37 = vld [vmem:[%s1920_s1 + $0x78] sm:$0xff] }
   0xa   :  { %1344 = vmatprep.subr.bf16.mxu0 %v1343_v8  ;;  %1372 = vmatprep.subr.bf16.mxu1 %v1371_v20  ;;  %v1383_v38 = vpack.c.bf16 %v218_v35, %v217_v34  ;;  %v1363_v39 = vpack.c.bf16 %v63_v37, %v62_v36  ;;  %v219_v40 = vld [vmem:[%s1922_s2 + $0x50] sm:$0xff]  ;;  %v220_v41 = vld [vmem:[%s1922_s2 + $0x58] sm:$0xff]  ;;  %v221_v43 = vld [vmem:[%s1922_s2 + $0x60] sm:$0xff] }
   0xb   :  { %v1387_v42 = vpack.c.bf16 %v220_v41, %v219_v40  ;;  %v222_v44 = vld [vmem:[%s1922_s2 + $0x68] sm:$0xff]  ;;  %v1671_v47 = vld [vmem:[%s1921_s0 + $0x10] sm:$0xff]  ;;  %v224_v49 = vld [vmem:[%s1922_s2 + $0x78] sm:$0xff] }
   0xc   :  { %v1666_v45 = vld [vmem:[%s1921_s0 + $0x8] sm:$0xff]  ;;  %v1391_v46 = vpack.c.bf16 %v222_v44, %v221_v43  ;;  %v223_v48 = vld [vmem:[%s1922_s2 + $0x70] sm:$0xff]  ;;  %v1684_v50 = vld [vmem:[%s1921_s0 + $0x18] sm:$0xff] }
   0xd   :  { %1346 = vmatpush3.bf16.msra.mxu0 %v1343_v8  ;;  %1374 = vmatpush3.bf16.msra.mxu1 %v1371_v20  ;;  %v1395_v51 = vpack.c.bf16 %v224_v49, %v223_v48  ;;  %v1689_v52 = vld [vmem:[%s1921_s0 + $0x20] sm:$0xff]  ;;  %v1696_v53 = vld [vmem:[%s1921_s0 + $0x28] sm:$0xff]  ;;  %v1701_v54 = vld [vmem:[%s1921_s0 + $0x30] sm:$0xff] }
   0xe   :  { %1348 = vmatprep.subr.bf16.mxu0 %v1347_v12  ;;  %1376 = vmatprep.subr.bf16.mxu1 %v1375_v26  ;;  %v1708_v55 = vld [vmem:[%s1921_s0 + $0x38] sm:$0xff]  ;;  %v1713_v56 = vld [vmem:[%s1921_s0 + $0x40] sm:$0xff]  ;;  %v1720_v57 = vld [vmem:[%s1921_s0 + $0x48] sm:$0xff] }
   0xf   :  { %v1725_v58 = vld [vmem:[%s1921_s0 + $0x50] sm:$0xff]  ;;  %v1732_v59 = vld [vmem:[%s1921_s0 + $0x58] sm:$0xff]  ;;  %v1737_v60 = vld [vmem:[%s1921_s0 + $0x60] sm:$0xff] }
  0x10   :  { %v1744_v61 = vld [vmem:[%s1921_s0 + $0x68] sm:$0xff]  ;;  %v1749_v62 = vld [vmem:[%s1921_s0 + $0x70] sm:$0xff]  ;;  %v1756_v63 = vld [vmem:[%s1921_s0 + $0x78] sm:$0xff] }
  0x11   :  { %1350 = vmatpush3.bf16.msra.mxu0 %v1347_v12  ;;  %1378 = vmatpush3.bf16.msra.mxu1 %v1375_v26  ;;  %v538_v16 = vld [vmem:[%s1923_s4] sm:$0xff]  ;;  %v539_v17 = vld [vmem:[%s1923_s4 + $0x8] sm:$0xff]  ;;  %v540_v18 = vld [vmem:[%s1923_s4 + $0x10] sm:$0xff] }
  0x12   :  { %1352 = vmatprep.subr.bf16.mxu0 %v1351_v21  ;;  %1380 = vmatprep.subr.bf16.mxu1 %v1379_v32  ;;  %v1431_v19 = vpack.c.bf16 %v539_v17, %v538_v16  ;;  %v541_v20 = vld [vmem:[%s1923_s4 + $0x18] sm:$0xff]  ;;  %v542_v22 = vld [vmem:[%s1923_s4 + $0x20] sm:$0xff]  ;;  %v543_v23 = vld [vmem:[%s1923_s4 + $0x28] sm:$0xff] }
  0x13   :  { %v1439_v24 = vpack.c.bf16 %v543_v23, %v542_v22  ;;  %v544_v25 = vld [vmem:[%s1923_s4 + $0x30] sm:$0xff]  ;;  %v545_v26 = vld [vmem:[%s1923_s4 + $0x38] sm:$0xff]  ;;  %v546_v28 = vld [vmem:[%s1923_s4 + $0x40] sm:$0xff] }
  0x14   :  { %v547_v29 = vld [vmem:[%s1923_s4 + $0x48] sm:$0xff]  ;;  %v548_v31 = vld [vmem:[%s1923_s4 + $0x50] sm:$0xff]  ;;  %v550_v34 = vld [vmem:[%s1923_s4 + $0x60] sm:$0xff] }
  0x15   :  { %1354 = vmatpush3.bf16.msra.mxu0 %v1351_v21  ;;  %1382 = vmatpush3.bf16.msra.mxu1 %v1379_v32  ;;  %v1435_v21 = vpack.c.bf16 %v541_v20, %v540_v18  ;;  %v1447_v30 = vpack.c.bf16 %v547_v29, %v546_v28  ;;  %v549_v32 = vld [vmem:[%s1923_s4 + $0x58] sm:$0xff]  ;;  %v551_v35 = vld [vmem:[%s1923_s4 + $0x68] sm:$0xff]  ;;  %v552_v37 = vld [vmem:[%s1923_s4 + $0x70] sm:$0xff] }
  0x16   :  { %1356 = vmatprep.subr.bf16.mxu0 %v1355_v27  ;;  %1384 = vmatprep.subr.bf16.mxu1 %v1383_v38  ;;  %v1455_v36 = vpack.c.bf16 %v551_v35, %v550_v34  ;;  %v1811_v40 = vld [vmem:[%s1924_s3] ss:$0 sm:$0xff] }
  0x19   :  { %1358 = vmatpush3.bf16.msra.mxu0 %v1355_v27  ;;  %1386 = vmatpush3.bf16.msra.mxu1 %v1383_v38  ;;  %v1443_v27 = vpack.c.bf16 %v545_v26, %v544_v25  ;;  %v553_v38 = vld [vmem:[%s1923_s4 + $0x78] sm:$0xff] }
  0x1a   :  { %1360 = vmatprep.subr.bf16.mxu0 %v1359_v33  ;;  %1388 = vmatprep.subr.bf16.mxu1 %v1387_v42 }
  0x1d   :  { %1362 = vmatpush3.bf16.msra.mxu0 %v1359_v33  ;;  %1390 = vmatpush3.bf16.msra.mxu1 %v1387_v42  ;;  %v1451_v33 = vpack.c.bf16 %v549_v32, %v548_v31 }
  0x1e   :  { %1364 = vmatprep.subr.bf16.mxu0 %v1363_v39  ;;  %1392 = vmatprep.subr.bf16.mxu1 %v1391_v46 }
  0x21   :  { %1366 = vmatpush3.bf16.msra.mxu0 %v1363_v39  ;;  %1394 = vmatpush3.bf16.msra.mxu1 %v1391_v46  ;;  %v1459_v39 = vpack.c.bf16 %v553_v38, %v552_v37 }
  0x22   :  { %1396 = vmatprep.subr.bf16.mxu1 %v1395_v51 }
  0x24   :  { %1074 = vmatmul.mubr.f32.vlgmr.msra.gmra.mrb[0].mxu0 %v1666_v45 }
  0x25   :  { %1076 = vmatprep.mubr.f32.mxu0 %v1671_v47  ;;  %1398 = vmatpush3.bf16.msra.mxu1 %v1395_v51 }
  0x26   :  { %1432 = vmatprep.subr.bf16.mxu1 %v1431_v19 }
  0x28   :  { %1077 = vmatmul.mubr.f32.gmra.mrb[2].mxu0 %v1684_v50 }
  0x29   :  { %1079 = vmatprep.mubr.f32.mxu0 %v1689_v52 }
  0x2c   :  { %1080 = vmatmul.mubr.f32.gmra.mrb[4].mxu0 %v1696_v53 }
  0x2d   :  { %1082 = vmatprep.mubr.f32.mxu0 %v1701_v54 }
  0x30   :  { %1083 = vmatmul.mubr.f32.gmra.mrb[6].mxu0 %v1708_v55 }
  0x31   :  { %1085 = vmatprep.mubr.f32.mxu0 %v1713_v56 }
  0x34   :  { %1086 = vmatmul.mubr.f32.gmra.mrb[8].mxu0 %v1720_v57 }
  0x35   :  { %1088 = vmatprep.mubr.f32.mxu0 %v1725_v58 }
  0x38   :  { %1089 = vmatmul.mubr.f32.gmra.mrb[10].mxu0 %v1732_v59 }
  0x39   :  { %1091 = vmatprep.mubr.f32.mxu0 %v1737_v60 }
  0x3c   :  { %1092 = vmatmul.mubr.f32.gmra.mrb[12].mxu0 %v1744_v61 }
  0x3d   :  { %1094 = vmatprep.mubr.f32.mxu0 %v1749_v62 }
  0x40   :  { %1095 = vmatmul.mubr.f32.gmra.mrb[14].mxu0 %v1756_v63 }
  0x41   :  { %1185 = vmatprep.mubr.f32.mxu0 %v1588_v9 }
  0xf7   :  { %v1075_v0 = vpop.f32.mrb[0].mxu0 }
  0xf8   :  { %v130_v1 = vpop.f32.mrb[1].mxu0 }
  0xf9   :  { %1129 = vmatprep.mubr.f32.mxu1 %v130_v1 }
  0xfa   :  { %1130 = vmatmul.mubr.f32.vlgmr.msra.gmra.mrb[0].mxu1 %v1075_v0 }
  0xfb   :  { %v1078_v2 = vpop.f32.mrb[2].mxu0  ;;  %1434 = vmatpush3.bf16.msra.mxu1 %v1431_v19 }
  0xfc   :  { %v140_v3 = vpop.f32.mrb[3].mxu0  ;;  %1436 = vmatprep.subr.bf16.mxu1 %v1435_v21 }
  0xfd   :  { %1132 = vmatprep.mubr.f32.mxu1 %v140_v3 }
  0xfe   :  { %1133 = vmatmul.mubr.f32.gmra.mrb[2].mxu1 %v1078_v2 }
  0xff   :  { %v1081_v4 = vpop.f32.mrb[4].mxu0  ;;  %1438 = vmatpush3.bf16.msra.mxu1 %v1435_v21 }
 0x100   :  { %v150_v5 = vpop.f32.mrb[5].mxu0  ;;  %1440 = vmatprep.subr.bf16.mxu1 %v1439_v24 }
 0x101   :  { %1135 = vmatprep.mubr.f32.mxu1 %v150_v5 }
 0x102   :  { %1136 = vmatmul.mubr.f32.gmra.mrb[4].mxu1 %v1081_v4 }
 0x103   :  { %v1084_v6 = vpop.f32.mrb[6].mxu0  ;;  %1442 = vmatpush3.bf16.msra.mxu1 %v1439_v24 }
 0x104   :  { %v160_v7 = vpop.f32.mrb[7].mxu0  ;;  %1444 = vmatprep.subr.bf16.mxu1 %v1443_v27 }
 0x105   :  { %1138 = vmatprep.mubr.f32.mxu1 %v160_v7 }
 0x106   :  { %1139 = vmatmul.mubr.f32.gmra.mrb[6].mxu1 %v1084_v6 }
 0x107   :  { %v1087_v8 = vpop.f32.mrb[8].mxu0  ;;  %1446 = vmatpush3.bf16.msra.mxu1 %v1443_v27 }
 0x108   :  { %v170_v10 = vpop.f32.mrb[9].mxu0  ;;  %1448 = vmatprep.subr.bf16.mxu1 %v1447_v30 }
 0x109   :  { %1141 = vmatprep.mubr.f32.mxu1 %v170_v10 }
 0x10a   :  { %1142 = vmatmul.mubr.f32.gmra.mrb[8].mxu1 %v1087_v8 }
 0x10b   :  { %v1090_v9 = vpop.f32.mrb[10].mxu0  ;;  %1450 = vmatpush3.bf16.msra.mxu1 %v1447_v30 }
 0x10c   :  { %v180_v11 = vpop.f32.mrb[11].mxu0  ;;  %1452 = vmatprep.subr.bf16.mxu1 %v1451_v33 }
 0x10d   :  { %1144 = vmatprep.mubr.f32.mxu1 %v180_v11 }
 0x10e   :  { %1145 = vmatmul.mubr.f32.gmra.mrb[10].mxu1 %v1090_v9 }
 0x10f   :  { %v1093_v12 = vpop.f32.mrb[12].mxu0  ;;  %1454 = vmatpush3.bf16.msra.mxu1 %v1451_v33 }
 0x110   :  { %v190_v13 = vpop.f32.mrb[13].mxu0  ;;  %1456 = vmatprep.subr.bf16.mxu1 %v1455_v36 }
 0x111   :  { %1147 = vmatprep.mubr.f32.mxu1 %v190_v13 }
 0x112   :  { %1148 = vmatmul.mubr.f32.gmra.mrb[12].mxu1 %v1093_v12 }
 0x113   :  { %v1096_v14 = vpop.f32.mrb[14].mxu0  ;;  %1458 = vmatpush3.bf16.msra.mxu1 %v1455_v36 }
 0x114   :  { %v200_v15 = vpop.f32.mrb[15].mxu0  ;;  %1460 = vmatprep.subr.bf16.mxu1 %v1459_v39 }
 0x115   :  { %1150 = vmatprep.mubr.f32.mxu1 %v200_v15 }
 0x116   :  { %1151 = vmatmul.mubr.f32.gmra.mrb[14].mxu1 %v1096_v14 }
 0x117   :  { %1462 = vmatpush3.bf16.msra.mxu1 %v1459_v39 }
 0x1cd   :  { %v1131_v41 = vpop.f32.mrb[0].mxu1 }
 0x1ce   :  { %v304_v42 = vadd.f32 %v1131_v41, %v1811_v40  ;;  %v298_v43 = vpop.f32.mrb[1].mxu1 }
 0x1cf   :  { %v299_v44 = vadd.f32 %v1811_v40, %v298_v43 }
 0x1d0   :  { %v378_v46 = vmax.f32 %v304_v42, 0.0 }
 0x1d1   :  { %v377_v48 = vmax.f32 %v299_v44, 0.0  ;;  %v1134_v49 = vpop.f32.mrb[2].mxu1 }
 0x1d2   :  { %v314_v51 = vadd.f32 %v1134_v49, %v1811_v40  ;;  %v308_v0 = vpop.f32.mrb[3].mxu1 }
 0x1d3   :  { %v1399_v1 = vpack.c.bf16 %v378_v46, %v377_v48  ;;  %v309_v2 = vadd.f32 %v1811_v40, %v308_v0  ;;  %v1514_v0 = vmov 0.0|0.0  }
 0x1d4   :  { %v380_v3 = vmax.f32 %v314_v51, 0.0  ;;  %1487 = vmatprep.subr.bf16.mxu1 %v1514_v0 }
 0x1d5   :  { %v379_v4 = vmax.f32 %v309_v2, 0.0  ;;  %v1137_v5 = vpop.f32.mrb[4].mxu1  ;;  %1400 = vmatprep.subr.bf16.mxu0 %v1399_v1  ;;  %v777_v2 = vld [vmem:[%s1925_s7] sm:$0xff] }
 0x1d6   :  { %v324_v6 = vadd.f32 %v1137_v5, %v1811_v40  ;;  %v318_v7 = vpop.f32.mrb[5].mxu1  ;;  %1402 = vmatpush3.bf16.msra.mxu0 %v1399_v1  ;;  %v1516_v1 = vmov 0.0  }
 0x1d7   :  { %v1403_v8 = vpack.c.bf16 %v380_v3, %v379_v4  ;;  %v319_v10 = vadd.f32 %v1811_v40, %v318_v7  ;;  %v778_v3 = vld [vmem:[%s1925_s7 + $0x8] sm:$0xff]  ;;  %v779_v4 = vld [vmem:[%s1925_s7 + $0x10] sm:$0xff] }
 0x1d8   :  { %v382_v9 = vmax.f32 %v324_v6, 0.0  ;;  %v1488_v5 = vpack.c.bf16 %v778_v3, %v777_v2  ;;  %v780_v6 = vld [vmem:[%s1925_s7 + $0x18] sm:$0xff] }
 0x1d9   :  { %v381_v11 = vmax.f32 %v319_v10, 0.0  ;;  %v1140_v12 = vpop.f32.mrb[6].mxu1  ;;  %1404 = vmatprep.subr.bf16.mxu0 %v1403_v8  ;;  %v1491_v7 = vpack.c.bf16 %v780_v6, %v779_v4  ;;  %v782_v10 = vld [vmem:[%s1925_s7 + $0x28] sm:$0xff]  ;;  %v706_v4 = vld [vmem:[%s1927_s6] sm:$0xff] }
 0x1da   :  { %v334_v13 = vadd.f32 %v1140_v12, %v1811_v40  ;;  %v328_v14 = vpop.f32.mrb[7].mxu1  ;;  %1406 = vmatpush3.bf16.msra.mxu0 %v1403_v8  ;;  %v781_v8 = vld [vmem:[%s1925_s7 + $0x20] sm:$0xff]  ;;  %v784_v12 = vld [vmem:[%s1925_s7 + $0x38] sm:$0xff] }
 0x1db   :  { %v1407_v15 = vpack.c.bf16 %v382_v9, %v381_v11  ;;  %v329_v16 = vadd.f32 %v1811_v40, %v328_v14  ;;  %v1494_v9 = vpack.c.bf16 %v782_v10, %v781_v8  ;;  %v783_v11 = vld [vmem:[%s1925_s7 + $0x30] sm:$0xff]  ;;  %v785_v14 = vld [vmem:[%s1925_s7 + $0x40] sm:$0xff] }
 0x1dc   :  { %v384_v17 = vmax.f32 %v334_v13, 0.0  ;;  %v1497_v13 = vpack.c.bf16 %v784_v12, %v783_v11 }
 0x1dd   :  { %v383_v18 = vmax.f32 %v329_v16, 0.0  ;;  %v1143_v19 = vpop.f32.mrb[8].mxu1  ;;  %1408 = vmatprep.subr.bf16.mxu0 %v1407_v15 }
 0x1de   :  { %v344_v20 = vadd.f32 %v1143_v19, %v1811_v40  ;;  %v338_v21 = vpop.f32.mrb[9].mxu1  ;;  %1410 = vmatpush3.bf16.msra.mxu0 %v1407_v15  ;;  %v786_v15 = vld [vmem:[%s1925_s7 + $0x48] sm:$0xff] }
 0x1df   :  { %v1411_v22 = vpack.c.bf16 %v384_v17, %v383_v18  ;;  %v339_v23 = vadd.f32 %v1811_v40, %v338_v21  ;;  %v1500_v16 = vpack.c.bf16 %v786_v15, %v785_v14  ;;  %v787_v17 = vld [vmem:[%s1925_s7 + $0x50] sm:$0xff]  ;;  %v788_v18 = vld [vmem:[%s1925_s7 + $0x58] sm:$0xff]  ;;  %v790_v21 = vld [vmem:[%s1925_s7 + $0x68] sm:$0xff] }
 0x1e0   :  { %v386_v24 = vmax.f32 %v344_v20, 0.0  ;;  %v1503_v19 = vpack.c.bf16 %v788_v18, %v787_v17  ;;  %v789_v20 = vld [vmem:[%s1925_s7 + $0x60] sm:$0xff] }
 0x1e1   :  { %v385_v25 = vmax.f32 %v339_v23, 0.0  ;;  %v1146_v26 = vpop.f32.mrb[10].mxu1  ;;  %1412 = vmatprep.subr.bf16.mxu0 %v1411_v22  ;;  %v791_v23 = vld [vmem:[%s1925_s7 + $0x70] sm:$0xff] }
 0x1e2   :  { %v354_v27 = vadd.f32 %v1146_v26, %v1811_v40  ;;  %v348_v28 = vpop.f32.mrb[11].mxu1  ;;  %1414 = vmatpush3.bf16.msra.mxu0 %v1411_v22  ;;  %v1506_v22 = vpack.c.bf16 %v790_v21, %v789_v20  ;;  %v877_v26 = vld [vmem:[%s1926_s5] ss:$0 sm:$0xff] }
 0x1e3   :  { %v1415_v29 = vpack.c.bf16 %v386_v24, %v385_v25  ;;  %v349_v30 = vadd.f32 %v1811_v40, %v348_v28  ;;  %v792_v24 = vld [vmem:[%s1925_s7 + $0x78] sm:$0xff] }
 0x1e4   :  { %v388_v31 = vmax.f32 %v354_v27, 0.0  ;;  %v1509_v25 = vpack.c.bf16 %v792_v24, %v791_v23 }
 0x1e5   :  { %v387_v32 = vmax.f32 %v349_v30, 0.0  ;;  %v1149_v33 = vpop.f32.mrb[12].mxu1  ;;  %1416 = vmatprep.subr.bf16.mxu0 %v1415_v29 }
 0x1e6   :  { %v364_v34 = vadd.f32 %v1149_v33, %v1811_v40  ;;  %v358_v35 = vpop.f32.mrb[13].mxu1  ;;  %1418 = vmatpush3.bf16.msra.mxu0 %v1415_v29 }
 0x1e7   :  { %v1419_v36 = vpack.c.bf16 %v388_v31, %v387_v32  ;;  %v359_v37 = vadd.f32 %v1811_v40, %v358_v35 }
 0x1e8   :  { %v390_v38 = vmax.f32 %v364_v34, 0.0 }
 0x1e9   :  { %v389_v39 = vmax.f32 %v359_v37, 0.0  ;;  %v1152_v41 = vpop.f32.mrb[14].mxu1  ;;  %1420 = vmatprep.subr.bf16.mxu0 %v1419_v36 }
 0x1ea   :  { %v374_v42 = vadd.f32 %v1152_v41, %v1811_v40  ;;  %v368_v43 = vpop.f32.mrb[15].mxu1  ;;  %1422 = vmatpush3.bf16.msra.mxu0 %v1419_v36 }
 0x1eb   :  { %v1423_v44 = vpack.c.bf16 %v390_v38, %v389_v39  ;;  %v369_v46 = vadd.f32 %v1811_v40, %v368_v43 }
 0x1ec   :  { %v392_v48 = vmax.f32 %v374_v42, 0.0 }
 0x1ed   :  { %v391_v49 = vmax.f32 %v369_v46, 0.0  ;;  %1424 = vmatprep.subr.bf16.mxu0 %v1423_v44 }
 0x1ee   :  { %1426 = vmatpush3.bf16.msra.mxu0 %v1423_v44 }
 0x1ef   :  { %v1427_v51 = vpack.c.bf16 %v392_v48, %v391_v49 }
 0x1f1   :  { %1428 = vmatprep.subr.bf16.mxu0 %v1427_v51 }
 0x1f2   :  { %1430 = vmatpush3.bf16.msra.mxu0 %v1427_v51 }
 0x1f3   :  { %1463 = vmatprep.subr.bf16.mxu0 %v1514_v0 }
 0x1f5   :  { %1186 = vmatmul.mubr.f32.vlgmr.msra.gmra.mrb[16].mxu0 %v1666_v45 }
 0x1f6   :  { %1188 = vmatprep.mubr.f32.mxu0 %v1671_v47 }
 0x1f9   :  { %1189 = vmatmul.mubr.f32.gmra.mrb[18].mxu0 %v1684_v50 }
 0x1fa   :  { %1191 = vmatprep.mubr.f32.mxu0 %v1689_v52 }
 0x1fd   :  { %1192 = vmatmul.mubr.f32.gmra.mrb[20].mxu0 %v1696_v53 }
 0x1fe   :  { %1194 = vmatprep.mubr.f32.mxu0 %v1701_v54 }
 0x201   :  { %1195 = vmatmul.mubr.f32.gmra.mrb[22].mxu0 %v1708_v55 }
 0x202   :  { %1197 = vmatprep.mubr.f32.mxu0 %v1713_v56 }
 0x205   :  { %1198 = vmatmul.mubr.f32.gmra.mrb[24].mxu0 %v1720_v57 }
 0x206   :  { %1200 = vmatprep.mubr.f32.mxu0 %v1725_v58 }
 0x209   :  { %1201 = vmatmul.mubr.f32.gmra.mrb[26].mxu0 %v1732_v59 }
 0x20a   :  { %1203 = vmatprep.mubr.f32.mxu0 %v1737_v60 }
 0x20d   :  { %1204 = vmatmul.mubr.f32.gmra.mrb[28].mxu0 %v1744_v61 }
 0x20e   :  { %1206 = vmatprep.mubr.f32.mxu0 %v1749_v62 }
 0x211   :  { %1207 = vmatmul.mubr.f32.gmra.mrb[30].mxu0 %v1756_v63 }
 0x212   :  { %1297 = vmatprep.mubr.msk.f32.mxu0 %vm1515_vm0, %v1516_v1 }
 0x2c8   :  { %v1187_v45 = vpop.f32.mrb[16].mxu0 }
 0x2c9   :  { %v459_v47 = vpop.f32.mrb[17].mxu0 }
 0x2ca   :  { %1241 = vmatprep.mubr.f32.mxu1 %v459_v47 }
 0x2cb   :  { %1242 = vmatmul.mubr.f32.vlgmr.msra.gmra.mrb[16].mxu1 %v1187_v45 }
 0x2cc   :  { %v1190_v50 = vpop.f32.mrb[18].mxu0  ;;  %1489 = vmatpush3.bf16.msra.mxu1 %v1488_v5 }
 0x2cd   :  { %v469_v52 = vpop.f32.mrb[19].mxu0  ;;  %1490 = vmatprep.subr.bf16.mxu1 %v1514_v0 }
 0x2ce   :  { %1244 = vmatprep.mubr.f32.mxu1 %v469_v52 }
 0x2cf   :  { %1245 = vmatmul.mubr.f32.gmra.mrb[18].mxu1 %v1190_v50 }
 0x2d0   :  { %v1193_v53 = vpop.f32.mrb[20].mxu0  ;;  %1492 = vmatpush3.bf16.msra.mxu1 %v1491_v7  ;;  %v878_v7 = vld [vmem:[%s1928_s8] ss:$0 sm:$0xff] }
 0x2d1   :  { %v479_v54 = vpop.f32.mrb[21].mxu0  ;;  %1493 = vmatprep.subr.bf16.mxu1 %v1514_v0 }
 0x2d2   :  { %1247 = vmatprep.mubr.f32.mxu1 %v479_v54 }
 0x2d3   :  { %1248 = vmatmul.mubr.f32.gmra.mrb[20].mxu1 %v1193_v53 }
 0x2d4   :  { %v1196_v55 = vpop.f32.mrb[22].mxu0  ;;  %1495 = vmatpush3.bf16.msra.mxu1 %v1494_v9 }
 0x2d5   :  { %v489_v56 = vpop.f32.mrb[23].mxu0  ;;  %1496 = vmatprep.subr.bf16.mxu1 %v1514_v0 }
 0x2d6   :  { %1250 = vmatprep.mubr.f32.mxu1 %v489_v56 }
 0x2d7   :  { %1251 = vmatmul.mubr.f32.gmra.mrb[22].mxu1 %v1196_v55 }
 0x2d8   :  { %v1199_v57 = vpop.f32.mrb[24].mxu0  ;;  %1498 = vmatpush3.bf16.msra.mxu1 %v1497_v13 }
 0x2d9   :  { %v499_v58 = vpop.f32.mrb[25].mxu0  ;;  %1499 = vmatprep.subr.bf16.mxu1 %v1514_v0 }
 0x2da   :  { %1253 = vmatprep.mubr.f32.mxu1 %v499_v58 }
 0x2db   :  { %1254 = vmatmul.mubr.f32.gmra.mrb[24].mxu1 %v1199_v57 }
 0x2dc   :  { %v1202_v59 = vpop.f32.mrb[26].mxu0  ;;  %1501 = vmatpush3.bf16.msra.mxu1 %v1500_v16 }
 0x2dd   :  { %v509_v60 = vpop.f32.mrb[27].mxu0  ;;  %1502 = vmatprep.subr.bf16.mxu1 %v1514_v0 }
 0x2de   :  { %1256 = vmatprep.mubr.f32.mxu1 %v509_v60 }
 0x2df   :  { %1257 = vmatmul.mubr.f32.gmra.mrb[26].mxu1 %v1202_v59 }
 0x2e0   :  { %v1205_v61 = vpop.f32.mrb[28].mxu0  ;;  %1504 = vmatpush3.bf16.msra.mxu1 %v1503_v19 }
 0x2e1   :  { %v519_v62 = vpop.f32.mrb[29].mxu0  ;;  %1505 = vmatprep.subr.bf16.mxu1 %v1514_v0 }
 0x2e2   :  { %1259 = vmatprep.mubr.f32.mxu1 %v519_v62 }
 0x2e3   :  { %1260 = vmatmul.mubr.f32.gmra.mrb[28].mxu1 %v1205_v61 }
 0x2e4   :  { %v1208_v63 = vpop.f32.mrb[30].mxu0  ;;  %1507 = vmatpush3.bf16.msra.mxu1 %v1506_v22 }
 0x2e5   :  { %v529_v40 = vpop.f32.mrb[31].mxu0  ;;  %1508 = vmatprep.subr.bf16.mxu1 %v1514_v0 }
 0x2e6   :  { %1262 = vmatprep.mubr.f32.mxu1 %v529_v40 }
 0x2e7   :  { %1263 = vmatmul.mubr.f32.gmra.mrb[30].mxu1 %v1208_v63 }
 0x2e8   :  { %1332 = vmatprep.mubr.msk.f32.mxu1 %vm1515_vm0, %v1516_v1  ;;  %1510 = vmatpush3.bf16.msra.mxu1 %v1509_v25 }
 0x39e   :  { %v1243_v27 = vpop.f32.mrb[16].mxu1 }
 0x39f   :  { %v633_v28 = vadd.f32 %v1243_v27, %v877_v26  ;;  %v627_v29 = vpop.f32.mrb[17].mxu1 }
 0x3a0   :  { %v628_v30 = vadd.f32 %v877_v26, %v627_v29 }
 0x3a2   :  { %v1464_v31 = vpack.c.bf16 %v633_v28, %v628_v30  ;;  %v1246_v32 = vpop.f32.mrb[18].mxu1 }
 0x3a3   :  { %v643_v33 = vadd.f32 %v1246_v32, %v877_v26  ;;  %v637_v34 = vpop.f32.mrb[19].mxu1 }
 0x3a4   :  { %v638_v35 = vadd.f32 %v877_v26, %v637_v34  ;;  %1465 = vmatpush3.bf16.msra.mxu0 %v1464_v31 }
 0x3a5   :  { %1466 = vmatprep.subr.bf16.mxu0 %v1514_v0 }
 0x3a6   :  { %v1467_v36 = vpack.c.bf16 %v643_v33, %v638_v35  ;;  %v1249_v37 = vpop.f32.mrb[20].mxu1 }
 0x3a7   :  { %v653_v38 = vadd.f32 %v1249_v37, %v877_v26  ;;  %v647_v39 = vpop.f32.mrb[21].mxu1 }
 0x3a8   :  { %v648_v41 = vadd.f32 %v877_v26, %v647_v39  ;;  %1468 = vmatpush3.bf16.msra.mxu0 %v1467_v36 }
 0x3a9   :  { %1469 = vmatprep.subr.bf16.mxu0 %v1514_v0 }
 0x3aa   :  { %v1470_v42 = vpack.c.bf16 %v653_v38, %v648_v41  ;;  %v1252_v43 = vpop.f32.mrb[22].mxu1 }
 0x3ab   :  { %v663_v44 = vadd.f32 %v1252_v43, %v877_v26  ;;  %v657_v46 = vpop.f32.mrb[23].mxu1 }
 0x3ac   :  { %v658_v48 = vadd.f32 %v877_v26, %v657_v46  ;;  %1471 = vmatpush3.bf16.msra.mxu0 %v1470_v42 }
 0x3ad   :  { %1472 = vmatprep.subr.bf16.mxu0 %v1514_v0 }
 0x3ae   :  { %v1473_v49 = vpack.c.bf16 %v663_v44, %v658_v48  ;;  %v1255_v51 = vpop.f32.mrb[24].mxu1 }
 0x3af   :  { %v673_v45 = vadd.f32 %v1255_v51, %v877_v26  ;;  %v667_v47 = vpop.f32.mrb[25].mxu1 }
 0x3b0   :  { %v668_v50 = vadd.f32 %v877_v26, %v667_v47  ;;  %1474 = vmatpush3.bf16.msra.mxu0 %v1473_v49 }
 0x3b1   :  { %1475 = vmatprep.subr.bf16.mxu0 %v1514_v0 }
 0x3b2   :  { %v1476_v52 = vpack.c.bf16 %v673_v45, %v668_v50  ;;  %v1258_v53 = vpop.f32.mrb[26].mxu1 }
 0x3b3   :  { %v683_v54 = vadd.f32 %v1258_v53, %v877_v26  ;;  %v677_v55 = vpop.f32.mrb[27].mxu1 }
 0x3b4   :  { %v678_v56 = vadd.f32 %v877_v26, %v677_v55  ;;  %1477 = vmatpush3.bf16.msra.mxu0 %v1476_v52 }
 0x3b5   :  { %1478 = vmatprep.subr.bf16.mxu0 %v1514_v0 }
 0x3b6   :  { %v1479_v57 = vpack.c.bf16 %v683_v54, %v678_v56  ;;  %v1261_v58 = vpop.f32.mrb[28].mxu1 }
 0x3b7   :  { %v693_v59 = vadd.f32 %v1261_v58, %v877_v26  ;;  %v687_v60 = vpop.f32.mrb[29].mxu1 }
 0x3b8   :  { %v688_v61 = vadd.f32 %v877_v26, %v687_v60  ;;  %1480 = vmatpush3.bf16.msra.mxu0 %v1479_v57 }
 0x3b9   :  { %1481 = vmatprep.subr.bf16.mxu0 %v1514_v0 }
 0x3ba   :  { %v1482_v62 = vpack.c.bf16 %v693_v59, %v688_v61  ;;  %v1264_v63 = vpop.f32.mrb[30].mxu1 }
 0x3bb   :  { %v703_v40 = vadd.f32 %v1264_v63, %v877_v26  ;;  %v697_v1 = vpop.f32.mrb[31].mxu1 }
 0x3bc   :  { %v698_v2 = vadd.f32 %v877_v26, %v697_v1  ;;  %1483 = vmatpush3.bf16.msra.mxu0 %v1482_v62 }
 0x3bd   :  { %1484 = vmatprep.subr.bf16.mxu0 %v1514_v0 }
 0x3be   :  { %v1485_v3 = vpack.c.bf16 %v703_v40, %v698_v2 }
 0x3c0   :  { %1486 = vmatpush3.bf16.msra.mxu0 %v1485_v3 }
 0x3c3   :  { %1298 = vmatmul.mubr.f32.vlgmr.msra.gmra.mrb[32].mxu0 %v706_v4 }
 0x496   :  { %v773_v5 = vpop.f32.mrb[32].mxu0 }
 0x497   :  { %v1299_v6 = vpop.f32.mrb[33].mxu0  ;;  %1333 = vmatmul.mubr.f32.vlgmr.msra.gmra.mrb[32].mxu1 %v773_v5 }
 0x56a   :  { %v866_v8 = vpop.f32.mrb[32].mxu1 }
 0x56b   :  { %v867_v10 = vadd.f32 %v878_v7, %v866_v8  ;;  %v1334_v9 = vpop.f32.mrb[33].mxu1 }
 0x56d   :  { %v870_v11 = vmax.f32 %v867_v10, 0.0 }
 0x56f   :  { %871 = vst [vmem:[%s1929_s9] sm:$0xff] %v870_v11 }

</bundles_post_ra>
